<compile_context>
chip_gen: v5e
topology: v5e:2x2
jax: 0.10.0
libtpu: 0.0.40
codegen_flags: <defaults>
</compile_context>

<pallas_src>
import jax
import jax.numpy as jnp
from jax.experimental import pallas as pl
from jax.experimental.pallas import tpu as pltpu

_LOG_CLAMP = -100.0   # PyTorch nn.BCELoss clamps log terms at -100
_LANES = 128


def _round_up(a, b):
    return -(-a // b) * b


def _choose_tile_rows(rows, max_tile_rows):
    """Pick a (multiple-of-8) row-tile: big tiles, but keep >=4 grid steps
    for medium/large inputs so pipelining / v7x core split stays effective."""
    max_tile_rows = max(8, (max_tile_rows // 8) * 8)
    tile = min(max_tile_rows, _round_up(rows, 8))
    if rows >= 4 * 1024:
        tile = min(tile, max(1024, _round_up(pl.cdiv(rows, 4), 8)))
    return tile


def _make_focal_kernel(tile_rows, n_rows, num_blocks, alpha, gamma, binary_targets):
    # Mask is only emitted when the grid actually overruns the array (static).
    needs_mask = (num_blocks * tile_rows) != n_rows

    def kernel(p_ref, t_ref, partial_ref):
        p = p_ref[...].astype(jnp.float32)
        t = t_ref[...].astype(jnp.float32)

        if binary_targets:
            # t in {0,1}: q = prob. of the true class; bce = -log(q); pt = q.
            # (Differs from the general path only when the -100 clamp fires,
            #  by < ~1e-43 in pt -- negligible.)
            q = jnp.where(t > 0.5, p, 1.0 - p)
            bce = -jnp.maximum(jnp.log(q), _LOG_CLAMP)
            one_minus_pt = 1.0 - q
        else:
            log_p = jnp.maximum(jnp.log(p), _LOG_CLAMP)
            log_1mp = jnp.maximum(jnp.log1p(-p), _LOG_CLAMP)
            s = t * log_p + (1.0 - t) * log_1mp        # s = -bce
            bce = -s
            one_minus_pt = 1.0 - jnp.exp(s)

        if gamma == 2:
            focal = one_minus_pt * one_minus_pt * bce
        else:
            focal = (one_minus_pt ** gamma) * bce
        if alpha != 1.0:
            focal = alpha * focal

        if needs_mask:
            row = jax.lax.broadcasted_iota(jnp.int32, focal.shape, 0)
            global_row = pl.program_id(0) * tile_rows + row
            # where() is a select: garbage/NaN in the overrun rows cannot leak.
            focal = jnp.where(global_row < n_rows, focal, 0.0)

        # Sublane-group partial reduce to a lane-dense (8, 128) accumulator.
        # The reshape groups whole (8,128) vregs -> no cross-lane movement.
        partial_ref[...] = jnp.sum(
            focal.reshape(tile_rows // 8, 8, _LANES), axis=0)

    return kernel


def focal_loss(inputs, targets, *, alpha=1.0, gamma=2, binary_targets=False,
               max_tile_rows=2048):
    """Mean focal loss. `inputs` are probabilities in (0,1], `targets` in [0,1].
    Set binary_targets=True (targets guaranteed 0/1) for the 1-transcendental
    fast path.  Inputs may be bf16 to halve HBM traffic (cast to f32 in-kernel)."""
    assert inputs.shape == targets.shape
    total = inputs.size
    assert total > 0

    p_flat = inputs.reshape(-1)
    t_flat = targets.reshape(-1)

    # Rare fallback: pad only up to the next multiple of 128 so the lane-dense
    # 2D reshape is legal.  p=1, t=1 contributes exactly zero loss (log clamp).
    # TODO(synk): handle total % 128 tails fully in-kernel via a 1D layout to
    # avoid this copy as well.
    if total % _LANES:
        pad = _LANES - total % _LANES
        p_flat = jnp.pad(p_flat, (0, pad), constant_values=1)
        t_flat = jnp.pad(t_flat, (0, pad), constant_values=1)

    n_rows = p_flat.size // _LANES
    tile_rows = _choose_tile_rows(n_rows, max_tile_rows)
    num_blocks = pl.cdiv(n_rows, tile_rows)

    # Free reshapes (contiguous): no extra HBM pass.
    p2d = p_flat.reshape(n_rows, _LANES)
    t2d = t_flat.reshape(n_rows, _LANES)

    kernel = _make_focal_kernel(tile_rows, n_rows, num_blocks,
                                float(alpha), gamma, binary_targets)

    elems = n_rows * _LANES
    cost = pl.CostEstimate(
        flops=10 * elems,
        transcendentals=(1 if binary_targets else 3) * elems,
        bytes_accessed=2 * elems * p2d.dtype.itemsize
                       + num_blocks * 8 * _LANES * 4,
    )

    partials = pl.pallas_call(
        kernel,
        out_shape=jax.ShapeDtypeStruct((num_blocks * 8, _LANES), jnp.float32),
        grid_spec=pltpu.PrefetchScalarGridSpec(
            num_scalar_prefetch=0,
            grid=(num_blocks,),
            in_specs=[
                pl.BlockSpec((tile_rows, _LANES), lambda i: (i, 0)),
                pl.BlockSpec((tile_rows, _LANES), lambda i: (i, 0)),
            ],
            out_specs=pl.BlockSpec((8, _LANES), lambda i: (i, 0)),
        ),
        compiler_params=pltpu.CompilerParams(
            # "parallel": independent blocks; on v7x this lets both TensorCores
            # stream (verify in profile; switch to pltpu.CORE_PARALLEL if not).
            dimension_semantics=("parallel",),
            # Headroom if callers raise max_tile_rows (v5e default is 16 MiB).
            vmem_limit_bytes=32 * 1024 * 1024,
        ),
        cost_estimate=cost,
    )(p2d, t2d)

    # Tiny final cross-lane reduce + mean outside the kernel.
    return jnp.sum(partials) / jnp.float32(total)


def focal_loss_ref(inputs, targets, alpha=1.0, gamma=2):
    p = inputs.astype(jnp.float32)
    t = targets.astype(jnp.float32)
    log_p = jnp.maximum(jnp.log(p), _LOG_CLAMP)
    log_1mp = jnp.maximum(jnp.log1p(-p), _LOG_CLAMP)
    bce = -(t * log_p + (1.0 - t) * log_1mp)
    pt = jnp.exp(-bce)
    focal = alpha * (1.0 - pt) ** gamma * bce
    return jnp.mean(focal)


if __name__ == "__main__":
    key = jax.random.PRNGKey(0)
    k1, k2, k3, k4 = jax.random.split(key, 4)

    # NCHW probabilities and binary targets (module has no learned params).
    shape = (2, 4, 16, 16)
    inputs = jax.nn.sigmoid(jax.random.normal(k1, shape, dtype=jnp.float32))
    targets = (jax.random.uniform(k2, shape) > 0.5).astype(jnp.float32)

    # General (soft-target-capable) path.
    loss = jax.block_until_ready(focal_loss(inputs, targets))
    ref = jax.block_until_ready(focal_loss_ref(inputs, targets))
    assert jnp.allclose(loss, ref, rtol=1e-5, atol=1e-6), (loss, ref)

    # Binary-target fast path (1 transcendental / element).
    loss_b = jax.block_until_ready(focal_loss(inputs, targets, binary_targets=True))
    assert jnp.allclose(loss_b, ref, rtol=1e-5, atol=1e-6), (loss_b, ref)

    # Soft targets exercise the general math.
    soft_t = jax.random.uniform(k3, shape, dtype=jnp.float32)
    loss_s = jax.block_until_ready(focal_loss(inputs, soft_t))
    ref_s = jax.block_until_ready(focal_loss_ref(inputs, soft_t))
    assert jnp.allclose(loss_s, ref_s, rtol=1e-5, atol=1e-6), (loss_s, ref_s)

    # Ragged row count (11 rows, tile 16) exercises the in-kernel tail mask.
    rag_p = jax.nn.sigmoid(jax.random.normal(k4, (11, 128), dtype=jnp.float32))
    rag_t = (jax.random.uniform(k2, (11, 128)) > 0.5).astype(jnp.float32)
    loss_r = jax.block_until_ready(focal_loss(rag_p, rag_t))
    ref_r = jax.block_until_ready(focal_loss_ref(rag_p, rag_t))
    assert jnp.allclose(loss_r, ref_r, rtol=1e-5, atol=1e-6), (loss_r, ref_r)

    print("KERNEL_OK")
</pallas_src>

<mosaic_0001>
module attributes {stable_mosaic.version = 11 : i64} {
  func.func @kernel(%arg0: i32, %arg1: memref<16x128xf32, #tpu.memory_space<vmem>>, %arg2: memref<16x128xf32, #tpu.memory_space<vmem>>, %arg3: memref<8x128xf32, #tpu.memory_space<vmem>>) attributes {dimension_semantics = [#tpu.dimension_semantics<parallel>], iteration_bounds = array<i64: 1>, scalar_prefetch = 0 : i64, scratch_operands = 0 : i64, tpu.core_type = #tpu.core_type<tc>, window_params = [{transform_indices = @transform_0, window_bounds = array<i64: 16, 128>}, {transform_indices = @transform_1, window_bounds = array<i64: 16, 128>}, {transform_indices = @transform_2, window_bounds = array<i64: 8, 128>}]} {
    %c0 = arith.constant 0 : index
    %c0_0 = arith.constant 0 : index
    %0 = vector.load %arg1[%c0, %c0_0] : memref<16x128xf32, #tpu.memory_space<vmem>>, vector<16x128xf32>
    %c0_1 = arith.constant 0 : index
    %c0_2 = arith.constant 0 : index
    %1 = vector.load %arg2[%c0_1, %c0_2] : memref<16x128xf32, #tpu.memory_space<vmem>>, vector<16x128xf32>
    %2 = math.log %0 : vector<16x128xf32>
    %cst = arith.constant -1.000000e+02 : f32
    %3 = vector.broadcast %cst : f32 to vector<16x128xf32>
    %4 = arith.maximumf %2, %3 : vector<16x128xf32>
    %cst_3 = arith.constant 0.000000e+00 : f32
    %5 = vector.broadcast %cst_3 : f32 to vector<16x128xf32>
    %6 = arith.subf %5, %0 : vector<16x128xf32>
    %7 = math.log1p %6 : vector<16x128xf32>
    %cst_4 = arith.constant -1.000000e+02 : f32
    %8 = vector.broadcast %cst_4 : f32 to vector<16x128xf32>
    %9 = arith.maximumf %7, %8 : vector<16x128xf32>
    %10 = arith.mulf %1, %4 : vector<16x128xf32>
    %cst_5 = arith.constant 1.000000e+00 : f32
    %11 = vector.broadcast %cst_5 : f32 to vector<16x128xf32>
    %12 = arith.subf %11, %1 : vector<16x128xf32>
    %13 = arith.mulf %12, %9 : vector<16x128xf32>
    %14 = arith.addf %10, %13 : vector<16x128xf32>
    %cst_6 = arith.constant 0.000000e+00 : f32
    %15 = vector.broadcast %cst_6 : f32 to vector<16x128xf32>
    %16 = arith.subf %15, %14 : vector<16x128xf32>
    %17 = math.exp %14 : vector<16x128xf32>
    %cst_7 = arith.constant 1.000000e+00 : f32
    %18 = vector.broadcast %cst_7 : f32 to vector<16x128xf32>
    %19 = arith.subf %18, %17 : vector<16x128xf32>
    %20 = arith.mulf %19, %19 : vector<16x128xf32>
    %21 = arith.mulf %20, %16 : vector<16x128xf32>
    %22 = vector.shape_cast %21 : vector<16x128xf32> to vector<2x8x128xf32>
    %cst_8 = arith.constant dense<0.000000e+00> : vector<8x128xf32>
    %23 = vector.multi_reduction <add>, %22, %cst_8 [0] : vector<2x8x128xf32> to vector<8x128xf32>
    %c0_9 = arith.constant 0 : index
    %c0_10 = arith.constant 0 : index
    %24 = vector.load %arg3[%c0_9, %c0_10] : memref<8x128xf32, #tpu.memory_space<vmem>>, vector<8x128xf32>
    tpu.vector_store %arg3[%c0_9, %c0_10], %23 {strides = array<i32>} : memref<8x128xf32, #tpu.memory_space<vmem>>, vector<8x128xf32>,
    return
  }
  func.func @transform_0(%arg0: i32) -> (i32, i32) {
    %c0_i32 = arith.constant 0 : i32
    %c0_i32_0 = arith.constant 0 : i32
    return %arg0, %c0_i32 : i32, i32
  }
  func.func @transform_1(%arg0: i32) -> (i32, i32) {
    %c0_i32 = arith.constant 0 : i32
    %c0_i32_0 = arith.constant 0 : i32
    return %arg0, %c0_i32 : i32, i32
  }
  func.func @transform_2(%arg0: i32) -> (i32, i32) {
    %c0_i32 = arith.constant 0 : i32
    %c0_i32_0 = arith.constant 0 : i32
    return %arg0, %c0_i32 : i32, i32
  }
}

</mosaic_0001>

<bundles_post_ra>
// kernel: tpu_custom_call.1
= control target key start
LH: loop header
LB: loop body
LE: loop exit
PB: predicated region body
PF: predicated region fallthrough
CT: control target
= control target key end

     0   :  { %7 = vsyncpa [#allocation3], 0  ;;  %s240_s0 = inlined_call_operand.hbm [shape: f32[16,128], index: 0, kind: input, shape index: {}]   ;;  %s241_s1 = inlined_call_operand.hbm [shape: f32[16,128], index: 1, kind: input, shape index: {}]   ;;  %s242_s2 = inlined_call_operand.hbm [shape: f32[8,128], index: 2, kind: output, shape index: {}]  }
   0x1   :  { %8 = vsyncpa [#allocation6], 0 }
   0x2   :  { %9 = vsyncpa [#allocation4], 0  ;;  %s14_s11 = sshll.u32 %s240_s0, 4  ;;  %s211_s12 = smov [#allocation2]   ;;  %s15_s11 = int_to_ptr.hbm [resolvable:$true] %s14_s11 }
   0x3   :  { %s16_s13 = sshll.u32 %s211_s12, 4  ;;  %s27_s16 = sshll.u32 %s241_s1, 4  ;;  %s17_s13 = int_to_ptr.vmem [resolvable:$true] %s16_s13  ;;  %s28_s16 = int_to_ptr.hbm [resolvable:$true] %s27_s16 }
   0x4   :  { %s212_s17 = smov 128   ;;  %s213_s18 = smov 8  }
   0x5   :  { %22 = dma.hbm_to_vmem [thread:$0]  %s15_s11, 256, %s17_s13, [#allocation3], %s212_s17, %s212_s17, %s213_s18  }
   0x6   :  { %s214_s19 = smov [#allocation5]  }
   0x7   :  { %s29_s20 = sshll.u32 %s214_s19, 4  ;;  %s30_s20 = int_to_ptr.vmem [resolvable:$true] %s29_s20 }
   0x8   :  { %35 = dma.hbm_to_vmem [thread:$0]  %s28_s16, 256, %s30_s20, [#allocation6], %s212_s17, %s212_s17, %s213_s18  }
   0x9   :  { %205 = dma.done.wait [#allocation3], 256  }
   0xa   :  { %206 = vsyncadd [#allocation3], 4294967040 }
   0xb   :  { %207 = dma.done.wait [#allocation6], 256  }
   0xc   :  { %208 = vsyncadd [#allocation6], 4294967040  ;;  %v44_v0 = vld [vmem:[#allocation2] sm:$0xff]  ;;  %v45_v1 = vld [vmem:[#allocation2 + $0x8] sm:$0xff]  ;;  %s215_s0 = smov [#allocation7]   ;;  %s105_s23 = sshll.u32 %s242_s2, 4  ;;  %s106_s23 = int_to_ptr.hbm [resolvable:$true] %s105_s23 }
   0xd   :  { %121 = vlog2.f32 %v44_v0  ;;  %v54_v2 = vsub.f32 0.0, %v44_v0  ;;  %v55_v3 = vsub.f32 0.0, %v45_v1  ;;  %v46_v16 = vld [vmem:[#allocation5] sm:$0xff]  ;;  %v47_v19 = vld [vmem:[#allocation5 + $0x8] sm:$0xff]  ;;  %s103_s1 = sshll.u32 %s215_s0, 4  ;;  %s104_s1 = int_to_ptr.vmem [resolvable:$true] %s103_s1 }
   0xe   :  { %123 = vlog2.f32 %v45_v1  ;;  %v78_v26 = vsub.f32 1.0, %v46_v16  ;;  %v79_v28 = vsub.f32 1.0, %v47_v19 }
   0xf   :  { %v56_v4 = vadd.f32 1.0, %v54_v2  ;;  %v59_v5 = vmul.f32 -0.5, %v54_v2  ;;  %v65_v6 = vadd.f32 1.0, %v55_v3  ;;  %v68_v7 = vmul.f32 -0.5, %v55_v3 }
  0x10   :  { %v62_v10 = vand.u32 2147483647, %v54_v2  ;;  %v71_v14 = vand.u32 2147483647, %v55_v3 }
  0x11   :  { %125 = vlog2.f32 %v56_v4  ;;  %v60_v8 = vadd.f32 1.0, %v59_v5  ;;  %v69_v11 = vadd.f32 1.0, %v68_v7 }
  0x12   :  { %127 = vlog2.f32 %v65_v6  ;;  %vm63_vm0 = vcmp.lt.f32.partialorder %v62_v10, 0.0004427343  ;;  %vm72_vm1 = vcmp.lt.f32.partialorder %v71_v14, 0.0004427343 }
  0x13   :  { %v122_v9 = vpop.eup %121  ;;  %v61_v17 = vmul.f32 %v60_v8, %v54_v2  ;;  %v70_v21 = vmul.f32 %v69_v11, %v55_v3 }
  0x14   :  { %v124_v12 = vpop.eup %123  ;;  %v49_v13 = vmul.f32 0.6931472, %v122_v9 }
  0x15   :  { %v51_v15 = vmul.f32 0.6931472, %v124_v12 }
  0x16   :  { %v52_v20 = vmax.f32 %v49_v13, -100.0 }
  0x17   :  { %v126_v18 = vpop.eup %125  ;;  %v53_v23 = vmax.f32 %v51_v15, -100.0 }
  0x18   :  { %v128_v22 = vpop.eup %127  ;;  %v58_v24 = vmul.f32 0.6931472, %v126_v18  ;;  %v76_v31 = vmul.f32 %v52_v20, %v46_v16 }
  0x19   :  { %v67_v25 = vmul.f32 0.6931472, %v128_v22  ;;  %v77_v33 = vmul.f32 %v53_v23, %v47_v19 }
  0x1a   :  { %v64_v27 = vsel %vm63_vm0, %v61_v17, %v58_v24 }
  0x1b   :  { %v73_v29 = vsel %vm72_vm1, %v70_v21, %v67_v25  ;;  %v74_v30 = vmax.f32 %v64_v27, -100.0 }
  0x1c   :  { %v75_v32 = vmax.f32 %v73_v29, -100.0 }
  0x1d   :  { %v80_v34 = vmul.f32 %v78_v26, %v74_v30 }
  0x1e   :  { %v81_v35 = vmul.f32 %v79_v28, %v75_v32 }
  0x1f   :  { %v82_v36 = vadd.f32 %v80_v34, %v76_v31 }
  0x20   :  { %v83_v37 = vadd.f32 %v81_v35, %v77_v33 }
  0x21   :  { %v86_v38 = vmul.f32 1.442695, %v82_v36  ;;  %v84_v42 = vsub.f32 0.0, %v82_v36 }
  0x22   :  { %v88_v39 = vmul.f32 1.442695, %v83_v37  ;;  %v85_v44 = vsub.f32 0.0, %v83_v37 }
  0x23   :  { %129 = vpow2.f32 %v86_v38 }
  0x24   :  { %131 = vpow2.f32 %v88_v39 }
  0x29   :  { %v130_v40 = vpop.eup %129 }
  0x2a   :  { %v132_v41 = vpop.eup %131  ;;  %v90_v43 = vsub.f32 1.0, %v130_v40 }
  0x2b   :  { %v91_v45 = vsub.f32 1.0, %v132_v41 }
  0x2c   :  { %v92_v46 = vmul.f32 %v90_v43, %v90_v43 }
  0x2d   :  { %v93_v47 = vmul.f32 %v91_v45, %v91_v45 }
  0x2e   :  { %v94_v48 = vmul.f32 %v92_v46, %v84_v42 }
  0x2f   :  { %v95_v49 = vmul.f32 %v93_v47, %v85_v44 }
  0x31   :  { %v96_v50 = vadd.f32 %v95_v49, %v94_v48 }
  0x33   :  { %97 = vst [vmem:[#allocation7] sm:$0xff] %v96_v50 }
  0x34   :  { %108 = dma.vmem_to_hbm [thread:$0]  %s104_s1, 128, %s106_s23, [#allocation4]  }
  0x35   :  { %209 = dma.done.wait [#allocation4], 128  }
  0x36   :  { %210 = vsyncadd [#allocation4], 4294967168 }
  0x37   :  { %113 = vsyncpa [#allocation3], 1 }
  0x38   :  { %114 = vsyncpa [#allocation6], 1 }
  0x39   :  { %115 = vsyncpa [#allocation4], 1 }

</bundles_post_ra>
